<compile_context>
chip_gen: v7x
topology: tpu7x:2x2x1
jax: 0.10.0
libtpu: 0.0.40
codegen_flags: <defaults>
</compile_context>

<pallas_src>
import functools
import math

import jax
import jax.numpy as jnp
from jax import lax
from jax.experimental import pallas as pl
from jax.experimental.pallas import tpu as pltpu

NEG_INF = -1e9
COMPUTE_DTYPE = jnp.bfloat16


def _pick(dim, target):
    """Tile size: target if it divides dim (target is (8,128)-friendly), else full dim."""
    return target if dim % target == 0 else dim


# ----------------------------------------------------------------------------
# Tiled matmul (+bias, +optional ReLU) kernel
# ----------------------------------------------------------------------------
def _mm_kernel(x_ref, w_ref, b_ref, o_ref, acc_ref, *, activation, nk):
    @pl.when(pl.program_id(2) == 0)
    def _():
        acc_ref[...] = jnp.zeros_like(acc_ref)

    acc_ref[...] += jnp.dot(x_ref[...], w_ref[...],
                            preferred_element_type=jnp.float32)

    @pl.when(pl.program_id(2) == nk - 1)
    def _():
        y = acc_ref[...] + b_ref[...].astype(jnp.float32)
        if activation == "relu":
            y = jnp.maximum(y, 0.0)
        o_ref[...] = y.astype(o_ref.dtype)


def matmul_bias(x2d, w, b, activation=None,
                tm_target=256, tn_target=256, tk_target=512):
    """x2d: (M, K) bf16, w: (K, N) bf16, b: (N,) f32 -> (M, N) bf16."""
    m, kdim = x2d.shape
    n = w.shape[1]
    tm, tn, tk = _pick(m, tm_target), _pick(n, tn_target), _pick(kdim, tk_target)
    nk = kdim // tk
    return pl.pallas_call(
        functools.partial(_mm_kernel, activation=activation, nk=nk),
        grid=(m // tm, n // tn, nk),
        in_specs=[
            pl.BlockSpec((tm, tk), lambda i, j, k: (i, k)),
            pl.BlockSpec((tk, tn), lambda i, j, k: (k, j)),
            pl.BlockSpec((1, tn), lambda i, j, k: (0, j)),
        ],
        out_specs=pl.BlockSpec((tm, tn), lambda i, j, k: (i, j)),
        out_shape=jax.ShapeDtypeStruct((m, n), x2d.dtype),
        scratch_shapes=[pltpu.VMEM((tm, tn), jnp.float32)],
        compiler_params=pltpu.CompilerParams(
            dimension_semantics=("parallel", "parallel", "arbitrary")),
        cost_estimate=pl.CostEstimate(
            flops=2 * m * n * kdim, transcendentals=0,
            bytes_accessed=(m * kdim + kdim * n + m * n) * 2 + n * 4),
    )(x2d, w.astype(x2d.dtype), b.reshape(1, n).astype(jnp.float32))


# ----------------------------------------------------------------------------
# Tiled matmul with fused bias + residual-add + LayerNorm epilogue
# ----------------------------------------------------------------------------
def _mm_res_ln_kernel(x_ref, w_ref, b_ref, r_ref, g_ref, bt_ref, o_ref, acc_ref,
                      *, nk, eps):
    @pl.when(pl.program_id(1) == 0)
    def _():
        acc_ref[...] = jnp.zeros_like(acc_ref)

    acc_ref[...] += jnp.dot(x_ref[...], w_ref[...],
                            preferred_element_type=jnp.float32)

    @pl.when(pl.program_id(1) == nk - 1)
    def _():
        s = acc_ref[...] + b_ref[...].astype(jnp.float32) + r_ref[...].astype(jnp.float32)
        mu = jnp.mean(s, axis=-1, keepdims=True)
        var = jnp.mean(jnp.square(s - mu), axis=-1, keepdims=True)
        y = (s - mu) * lax.rsqrt(var + eps)
        y = y * g_ref[...].astype(jnp.float32) + bt_ref[...].astype(jnp.float32)
        o_ref[...] = y.astype(o_ref.dtype)


def matmul_bias_residual_ln(x2d, w, b, residual2d, gamma, beta, eps=1e-5,
                            tm_target=256, tk_target=512):
    """LayerNorm(residual + x2d @ w + b); LN needs full rows so N is untiled."""
    m, kdim = x2d.shape
    n = w.shape[1]
    tm, tk = _pick(m, tm_target), _pick(kdim, tk_target)
    nk = kdim // tk
    return pl.pallas_call(
        functools.partial(_mm_res_ln_kernel, nk=nk, eps=eps),
        grid=(m // tm, nk),
        in_specs=[
            pl.BlockSpec((tm, tk), lambda i, k: (i, k)),
            pl.BlockSpec((tk, n), lambda i, k: (k, 0)),
            pl.BlockSpec((1, n), lambda i, k: (0, 0)),
            pl.BlockSpec((tm, n), lambda i, k: (i, 0)),
            pl.BlockSpec((1, n), lambda i, k: (0, 0)),
            pl.BlockSpec((1, n), lambda i, k: (0, 0)),
        ],
        out_specs=pl.BlockSpec((tm, n), lambda i, k: (i, 0)),
        out_shape=jax.ShapeDtypeStruct((m, n), x2d.dtype),
        scratch_shapes=[pltpu.VMEM((tm, n), jnp.float32)],
        compiler_params=pltpu.CompilerParams(
            dimension_semantics=("parallel", "arbitrary")),
        cost_estimate=pl.CostEstimate(
            flops=2 * m * n * kdim + 8 * m * n, transcendentals=0,
            bytes_accessed=(m * kdim + kdim * n + 2 * m * n) * 2 + 3 * n * 4),
    )(x2d, w.astype(x2d.dtype), b.reshape(1, n).astype(jnp.float32),
      residual2d, gamma.reshape(1, n).astype(jnp.float32),
      beta.reshape(1, n).astype(jnp.float32))


# ----------------------------------------------------------------------------
# LayerNorm family: LN(x [+ y] [+ vec]) [+ vec], gamma/beta/vec are (1, D)
# ----------------------------------------------------------------------------
def _ln_kernel(x_ref, *rest, has_add, has_vec, vec_after, eps):
    rest = list(rest)
    a_ref = rest.pop(0) if has_add else None
    v_ref = rest.pop(0) if has_vec else None
    g_ref, b_ref, o_ref = rest

    s = x_ref[...].astype(jnp.float32)
    if has_add:
        s = s + a_ref[...].astype(jnp.float32)
    if has_vec and not vec_after:
        s = s + v_ref[...].astype(jnp.float32)
    mu = jnp.mean(s, axis=-1, keepdims=True)
    var = jnp.mean(jnp.square(s - mu), axis=-1, keepdims=True)
    y = (s - mu) * lax.rsqrt(var + eps)
    y = y * g_ref[...].astype(jnp.float32) + b_ref[...].astype(jnp.float32)
    if has_vec and vec_after:
        y = y + v_ref[...].astype(jnp.float32)
    o_ref[...] = y.astype(o_ref.dtype)


def ln_fused(x, gamma, beta, add=None, vec=None, vec_after_ln=False,
             eps=1e-5, tm_target=256):
    shp = x.shape
    d = shp[-1]
    x2 = x.reshape(-1, d)
    m = x2.shape[0]
    tm = _pick(m, tm_target)

    ins = [x2]
    specs = [pl.BlockSpec((tm, d), lambda i: (i, 0))]
    if add is not None:
        ins.append(add.reshape(-1, d))
        specs.append(pl.BlockSpec((tm, d), lambda i: (i, 0)))
    if vec is not None:
        ins.append(vec.reshape(1, d).astype(jnp.float32))
        specs.append(pl.BlockSpec((1, d), lambda i: (0, 0)))
    ins += [gamma.reshape(1, d).astype(jnp.float32),
            beta.reshape(1, d).astype(jnp.float32)]
    specs += [pl.BlockSpec((1, d), lambda i: (0, 0)),
              pl.BlockSpec((1, d), lambda i: (0, 0))]

    out = pl.pallas_call(
        functools.partial(_ln_kernel, has_add=add is not None,
                          has_vec=vec is not None, vec_after=vec_after_ln, eps=eps),
        grid=(m // tm,),
        in_specs=specs,
        out_specs=pl.BlockSpec((tm, d), lambda i: (i, 0)),
        out_shape=jax.ShapeDtypeStruct((m, d), x.dtype),
        compiler_params=pltpu.CompilerParams(dimension_semantics=("parallel",)),
    )(*ins)
    return out.reshape(shp)


# ----------------------------------------------------------------------------
# Attention kernel: grid over batch, static head loop, ONE lane-dense store
# ----------------------------------------------------------------------------
def _attn_kernel(a_ref, b_ref, mask_ref, o_ref, *, num_heads, dh, k_in_a, scale):
    # a_ref: (1, Lq, D) = Q   (or (1, Lq, 2D) = [Q|K] when k_in_a)
    # b_ref: (1, Lk, 2D) = [K|V]  (or (1, Lk, D) = V when k_in_a)
    d = num_heads * dh
    a = a_ref[0]
    bmat = b_ref[0]
    add_mask = (1.0 - mask_ref[0].astype(jnp.float32)) * NEG_INF   # (1, Lk)

    ctxs = []
    for h in range(num_heads):
        q = a[:, h * dh:(h + 1) * dh]
        if k_in_a:
            k = a[:, d + h * dh: d + (h + 1) * dh]
            v = bmat[:, h * dh:(h + 1) * dh]
        else:
            k = bmat[:, h * dh:(h + 1) * dh]
            v = bmat[:, d + h * dh: d + (h + 1) * dh]
        # scores: contract head dims directly (no explicit transpose copy)
        s = lax.dot_general(q, k, (((1,), (1,)), ((), ())),
                            preferred_element_type=jnp.float32)
        s = s * scale + add_mask
        s = s - jnp.max(s, axis=-1, keepdims=True)
        p = jnp.exp(s)
        p = p * pl.reciprocal(jnp.sum(p, axis=-1, keepdims=True), approx=True)
        ctx = lax.dot_general(p.astype(v.dtype), v, (((1,), (0,)), ((), ())),
                              preferred_element_type=jnp.float32)
        ctxs.append(ctx.astype(o_ref.dtype))
    # Single lane-dense (Lq, D) store (avoids num_heads masked partial stores).
    o_ref[0] = jnp.concatenate(ctxs, axis=-1)


def attention(a, b_in, mask3, num_heads, dh, k_in_a):
    """a: (B, Lq, D|2D), b_in: (B, Lk, D|2D), mask3: (B, 1, Lk) 0/1 floats."""
    # TODO(synk): for production deformable-DETR token counts use a flash-style
    # KV-tiled online-softmax variant instead of the dense (Lq, Lk) score tile.
    bsz, lq, da = a.shape
    lk, db = b_in.shape[1], b_in.shape[2]
    d = num_heads * dh
    scale = 1.0 / math.sqrt(dh)
    itemsize = jnp.dtype(a.dtype).itemsize
    return pl.pallas_call(
        functools.partial(_attn_kernel, num_heads=num_heads, dh=dh,
                          k_in_a=k_in_a, scale=scale),
        grid=(bsz,),
        in_specs=[
            pl.BlockSpec((1, lq, da), lambda i: (i, 0, 0)),
            pl.BlockSpec((1, lk, db), lambda i: (i, 0, 0)),
            pl.BlockSpec((1, 1, lk), lambda i: (i, 0, 0)),
        ],
        out_specs=pl.BlockSpec((1, lq, d), lambda i: (i, 0, 0)),
        out_shape=jax.ShapeDtypeStruct((bsz, lq, d), a.dtype),
        compiler_params=pltpu.CompilerParams(dimension_semantics=("parallel",)),
        cost_estimate=pl.CostEstimate(
            flops=4 * bsz * num_heads * lq * lk * dh,
            transcendentals=bsz * num_heads * lq * lk,
            bytes_accessed=(a.size + b_in.size + bsz * lq * d) * itemsize
                           + bsz * lk * 4),
    )(a, b_in, mask3)


# ----------------------------------------------------------------------------
# Multi-head attention wrappers (fused QK / KV projections)
# ----------------------------------------------------------------------------
def mha_self(p, qk_src, v_src, key_mask3, num_heads):
    """Self-attention context (pre out-projection), Q/K fused from qk_src."""
    b, l, d = qk_src.shape
    dh = d // num_heads
    qk = matmul_bias(qk_src.reshape(-1, d), p["w_qk"], p["b_qk"]).reshape(b, l, 2 * d)
    v = matmul_bias(v_src.reshape(-1, d), p["w_v"], p["b_v"]).reshape(b, l, d)
    ctx = attention(qk, v, key_mask3, num_heads, dh, k_in_a=True)
    return ctx.reshape(b * l, d)


def mha_cross(p, q_src, kv_src, key_mask3, num_heads):
    """Cross-attention context (pre out-projection), K/V fused from kv_src."""
    b, lq, d = q_src.shape
    lk = kv_src.shape[1]
    dh = d // num_heads
    q = matmul_bias(q_src.reshape(-1, d), p["w_q"], p["b_q"]).reshape(b, lq, d)
    kv = matmul_bias(kv_src.reshape(-1, d), p["w_kv"], p["b_kv"]).reshape(b, lk, 2 * d)
    ctx = attention(q, kv, key_mask3, num_heads, dh, k_in_a=False)
    return ctx.reshape(b * lq, d)


# ----------------------------------------------------------------------------
# Encoder layers
# ----------------------------------------------------------------------------
def deformable_encoder_layer(p, hidden, pos, vis_mask3, num_heads):
    # TODO(synk): DeformableDetrEncoderLayer's multi-scale deformable sampling
    # is replaced with dense multi-head self-attention (reference_points unused).
    b, l, d = hidden.shape
    qk_src = hidden + pos
    ctx = mha_self(p["self_attn"], qk_src, hidden, vis_mask3, num_heads)
    hidden = matmul_bias_residual_ln(
        ctx, p["self_attn"]["w_o"], p["self_attn"]["b_o"],
        hidden.reshape(-1, d), p["sa_ln_g"], p["sa_ln_b"]).reshape(b, l, d)
    ff = matmul_bias(hidden.reshape(-1, d), p["fc1_w"], p["fc1_b"], activation="relu")
    hidden = matmul_bias_residual_ln(
        ff, p["fc2_w"], p["fc2_b"],
        hidden.reshape(-1, d), p["final_ln_g"], p["final_ln_b"]).reshape(b, l, d)
    return hidden


def cross_encoder_layer(p, x, y, x_mask3, y_mask3, num_heads, pos=None):
    # TODO(synk): VisionCrossEncoderLayer/LanguageCrossEncoderLayer internals are
    # not provided; implemented as self-attn + cross-attn + FFN with post-LN residuals.
    b, l, d = x.shape
    q_src = x + pos if pos is not None else x
    sa = mha_self(p["self_attn"], q_src, x, x_mask3, num_heads)
    x = matmul_bias_residual_ln(
        sa, p["self_attn"]["w_o"], p["self_attn"]["b_o"],
        x.reshape(-1, d), p["sa_ln_g"], p["sa_ln_b"]).reshape(b, l, d)
    ca = mha_cross(p["cross_attn"], x, y, y_mask3, num_heads)
    x = matmul_bias_residual_ln(
        ca, p["cross_attn"]["w_o"], p["cross_attn"]["b_o"],
        x.reshape(-1, d), p["ca_ln_g"], p["ca_ln_b"]).reshape(b, l, d)
    ff = matmul_bias(x.reshape(-1, d), p["fc1_w"], p["fc1_b"], activation="relu")
    x = matmul_bias_residual_ln(
        ff, p["fc2_w"], p["fc2_b"],
        x.reshape(-1, d), p["final_ln_g"], p["final_ln_b"]).reshape(b, l, d)
    return x


def get_reference_points(spatial_shapes, valid_ratios):
    ref_list = []
    for lvl, (h, w) in enumerate(spatial_shapes):
        ref_y, ref_x = jnp.meshgrid(jnp.linspace(0.5, h - 0.5, h),
                                    jnp.linspace(0.5, w - 0.5, w), indexing="ij")
        ref_y = ref_y.reshape(-1)[None] / (valid_ratios[:, None, lvl, 1] * h)
        ref_x = ref_x.reshape(-1)[None] / (valid_ratios[:, None, lvl, 0] * w)
        ref_list.append(jnp.stack((ref_x, ref_y), -1))
    reference_points = jnp.concatenate(ref_list, 1)
    return reference_points[:, :, None] * valid_ratios[:, None]


# ----------------------------------------------------------------------------
# Full forward pass (mirrors VisionLanguageSimpleBridgeEncoder.forward)
# ----------------------------------------------------------------------------
def vl_simple_bridge_forward(params, vision_embeds, vision_attention_mask,
                             text_embeds, text_attention_mask,
                             position_embeddings, spatial_shapes, valid_ratios,
                             num_heads):
    vision = vision_embeds.astype(COMPUTE_DTYPE)
    pos = position_embeddings.astype(COMPUTE_DTYPE)
    text_embeds = text_embeds.astype(COMPUTE_DTYPE)

    b, lv, d = vision.shape
    lt = text_embeds.shape[2]
    vis_mask3 = vision_attention_mask.reshape(b, 1, lv).astype(jnp.float32)
    txt_mask3 = text_attention_mask.reshape(b, 1, lt).astype(jnp.float32)

    _ = get_reference_points(spatial_shapes, valid_ratios)  # unused by dense-attn stand-in

    num_layers = len(params["v_layers"])
    text_tte = params["token_type"][0]     # (D,)
    image_tte = params["token_type"][1]    # (D,)

    vision = deformable_encoder_layer(params["v_layers"][0], vision, pos,
                                      vis_mask3, num_heads)

    cross_modal_text = ln_fused(text_embeds[0], params["cm_text_ln_g"],
                                params["cm_text_ln_b"], vec=text_tte,
                                vec_after_ln=False)
    image_w_ln = ln_fused(vision, params["v_ln_post_g"], params["v_ln_post_b"],
                          vec=image_tte, vec_after_ln=True)
    cross_modal_image = ln_fused(image_w_ln, params["cm_image_ln_g"],
                                 params["cm_image_ln_b"])

    cross_text = cross_encoder_layer(params["text_cross_layers"][0],
                                     cross_modal_text, cross_modal_image,
                                     txt_mask3, vis_mask3, num_heads)
    cross_image = cross_encoder_layer(params["image_cross_layers"][0],
                                      cross_modal_image, cross_modal_text,
                                      vis_mask3, txt_mask3, num_heads, pos=pos)

    for i in range(1, num_layers):
        vision = deformable_encoder_layer(params["v_layers"][i], vision, pos,
                                          vis_mask3, num_heads)
        image_w_ln = ln_fused(vision, params["v_ln_post_g"], params["v_ln_post_b"],
                              vec=image_tte, vec_after_ln=True)

        lt_p = params["text_link_ln"][i - 1]
        li_p = params["image_link_ln"][i - 1]
        # LinkTower('add'): LayerNorm(hidden + cross_modal_hidden)
        cross_text_ = ln_fused(text_embeds[i], lt_p["g"], lt_p["b"],
                               add=cross_text, vec=text_tte, vec_after_ln=False)
        cross_image_ = ln_fused(image_w_ln, li_p["g"], li_p["b"], add=cross_image)

        cross_text = cross_encoder_layer(params["text_cross_layers"][i],
                                         cross_text_, cross_image_,
                                         txt_mask3, vis_mask3, num_heads)
        cross_image = cross_encoder_layer(params["image_cross_layers"][i],
                                          cross_image_, cross_text_,
                                          vis_mask3, txt_mask3, num_heads, pos=pos)

    return cross_image, cross_text


# ----------------------------------------------------------------------------
# Deterministic parameter initialization (mirrors init_weights; bf16 matmul weights)
# ----------------------------------------------------------------------------
def init_params(key, num_layers, d_model, ffn_dim):
    kit = iter(jax.random.split(key, 1024))

    def nrm(shape, dtype=COMPUTE_DTYPE):
        return (0.02 * jax.random.normal(next(kit), shape)).astype(dtype)

    def zeros(*s):
        return jnp.zeros(s, jnp.float32)

    def ones(*s):
        return jnp.ones(s, jnp.float32)

    def self_attn_p():
        return dict(w_qk=nrm((d_model, 2 * d_model)), b_qk=zeros(2 * d_model),
                    w_v=nrm((d_model, d_model)), b_v=zeros(d_model),
                    w_o=nrm((d_model, d_model)), b_o=zeros(d_model))

    def cross_attn_p():
        return dict(w_q=nrm((d_model, d_model)), b_q=zeros(d_model),
                    w_kv=nrm((d_model, 2 * d_model)), b_kv=zeros(2 * d_model),
                    w_o=nrm((d_model, d_model)), b_o=zeros(d_model))

    def enc_layer(cross=False):
        p = dict(self_attn=self_attn_p(),
                 sa_ln_g=ones(d_model), sa_ln_b=zeros(d_model),
                 fc1_w=nrm((d_model, ffn_dim)), fc1_b=zeros(ffn_dim),
                 fc2_w=nrm((ffn_dim, d_model)), fc2_b=zeros(d_model),
                 final_ln_g=ones(d_model), final_ln_b=zeros(d_model))
        if cross:
            p.update(cross_attn=cross_attn_p(),
                     ca_ln_g=ones(d_model), ca_ln_b=zeros(d_model))
        return p

    return dict(
        v_layers=[enc_layer() for _ in range(num_layers)],
        v_ln_post_g=ones(d_model), v_ln_post_b=zeros(d_model),
        token_type=nrm((2, d_model), jnp.float32),
        cm_text_ln_g=ones(d_model), cm_text_ln_b=zeros(d_model),
        cm_image_ln_g=ones(d_model), cm_image_ln_b=zeros(d_model),
        text_cross_layers=[enc_layer(cross=True) for _ in range(num_layers)],
        image_cross_layers=[enc_layer(cross=True) for _ in range(num_layers)],
        text_link_ln=[dict(g=ones(d_model), b=zeros(d_model))
                      for _ in range(num_layers - 1)],
        image_link_ln=[dict(g=ones(d_model), b=zeros(d_model))
                       for _ in range(num_layers - 1)],
    )


# ----------------------------------------------------------------------------
# Main
# ----------------------------------------------------------------------------
if __name__ == "__main__":
    B, D, NUM_HEADS, FFN = 2, 32, 2, 64
    NUM_LAYERS = 2
    H_IMG, W_IMG = 4, 4
    LV = H_IMG * W_IMG            # 16 vision tokens (single feature level)
    LT = 8                        # text tokens
    spatial_shapes = [(H_IMG, W_IMG)]

    key = jax.random.PRNGKey(0)
    k_param, k_v, k_t, k_p = jax.random.split(key, 4)

    params = init_params(k_param, NUM_LAYERS, D, FFN)
    vision_embeds = jax.random.normal(k_v, (B, LV, D), jnp.float32)
    text_embeds = jax.random.normal(k_t, (NUM_LAYERS, B, LT, D), jnp.float32)
    position_embeddings = jax.random.normal(k_p, (B, LV, D), jnp.float32)
    vision_attention_mask = jnp.ones((B, LV), jnp.float32)
    text_attention_mask = jnp.ones((B, LT), jnp.float32).at[:, -2:].set(0.0)
    valid_ratios = jnp.ones((B, len(spatial_shapes), 2), jnp.float32)

    cross_image, cross_text = vl_simple_bridge_forward(
        params, vision_embeds, vision_attention_mask, text_embeds,
        text_attention_mask, position_embeddings, spatial_shapes,
        valid_ratios, NUM_HEADS)

    jax.block_until_ready((cross_image, cross_text))
    assert cross_image.shape == (B, LV, D) and cross_text.shape == (B, LT, D)
    assert bool(jnp.all(jnp.isfinite(cross_image.astype(jnp.float32))))
    assert bool(jnp.all(jnp.isfinite(cross_text.astype(jnp.float32))))
    print("KERNEL_OK")
</pallas_src>

<mosaic_0001>
module attributes {stable_mosaic.version = 11 : i64} {
  func.func @_mm_kernel(%arg0: i32, %arg1: i32, %arg2: i32, %arg3: memref<32x32xbf16, #tpu.memory_space<vmem>>, %arg4: memref<32x64xbf16, #tpu.memory_space<vmem>>, %arg5: memref<1x64xf32, #tpu.memory_space<vmem>>, %arg6: memref<32x64xbf16, #tpu.memory_space<vmem>>, %arg7: memref<32x64xf32, #tpu.memory_space<vmem>>) attributes {dimension_semantics = [#tpu.dimension_semantics<parallel>, #tpu.dimension_semantics<parallel>, #tpu.dimension_semantics<arbitrary>], iteration_bounds = array<i64: 1, 1, 1>, scalar_prefetch = 0 : i64, scratch_operands = 1 : i64, tpu.core_type = #tpu.core_type<tc>, window_params = [{transform_indices = @transform_0, window_bounds = array<i64: 32, 32>}, {transform_indices = @transform_1, window_bounds = array<i64: 32, 64>}, {transform_indices = @transform_2, window_bounds = array<i64: 1, 64>}, {transform_indices = @transform_3, window_bounds = array<i64: 32, 64>}]} {
    %c0_i32 = arith.constant 0 : i32
    %0 = arith.cmpi eq, %arg2, %c0_i32 : i32
    %1 = arith.extui %0 : i1 to i32
    %c0_i32_0 = arith.constant 0 : i32
    %2 = arith.cmpi ne, %1, %c0_i32_0 : i32
    scf.if %2 {
      %cst_10 = arith.constant 0.000000e+00 : f32
      %12 = vector.broadcast %cst_10 : f32 to vector<32x64xf32>
      %c0_11 = arith.constant 0 : index
      %c0_12 = arith.constant 0 : index
      %13 = vector.load %arg7[%c0_11, %c0_12] : memref<32x64xf32, #tpu.memory_space<vmem>>, vector<32x64xf32>
      tpu.vector_store %arg7[%c0_11, %c0_12], %12 {strides = array<i32>} : memref<32x64xf32, #tpu.memory_space<vmem>>, vector<32x64xf32>,
    } else {
    }
    %c0 = arith.constant 0 : index
    %c0_1 = arith.constant 0 : index
    %3 = vector.load %arg7[%c0, %c0_1] : memref<32x64xf32, #tpu.memory_space<vmem>>, vector<32x64xf32>
    %c0_2 = arith.constant 0 : index
    %c0_3 = arith.constant 0 : index
    %4 = vector.load %arg3[%c0_2, %c0_3] : memref<32x32xbf16, #tpu.memory_space<vmem>>, vector<32x32xbf16>
    %c0_4 = arith.constant 0 : index
    %c0_5 = arith.constant 0 : index
    %5 = vector.load %arg4[%c0_4, %c0_5] : memref<32x64xbf16, #tpu.memory_space<vmem>>, vector<32x64xbf16>
    %cst = arith.constant dense<0.000000e+00> : vector<32x64xf32>
    %6 = tpu.matmul %4, %5, %cst {dimension_numbers = #tpu.dot_dimension_numbers<[1], [0], [0], [1], [0, 0, 1, 1], [], []>} : vector<32x32xbf16>, vector<32x64xbf16>, vector<32x64xf32> -> vector<32x64xf32>
    %7 = arith.addf %3, %6 : vector<32x64xf32>
    %c0_6 = arith.constant 0 : index
    %c0_7 = arith.constant 0 : index
    %8 = vector.load %arg7[%c0_6, %c0_7] : memref<32x64xf32, #tpu.memory_space<vmem>>, vector<32x64xf32>
    tpu.vector_store %arg7[%c0_6, %c0_7], %7 {strides = array<i32>} : memref<32x64xf32, #tpu.memory_space<vmem>>, vector<32x64xf32>,
    %c0_i32_8 = arith.constant 0 : i32
    %9 = arith.cmpi eq, %arg2, %c0_i32_8 : i32
    %10 = arith.extui %9 : i1 to i32
    %c0_i32_9 = arith.constant 0 : i32
    %11 = arith.cmpi ne, %10, %c0_i32_9 : i32
    scf.if %11 {
      %c0_10 = arith.constant 0 : index
      %c0_11 = arith.constant 0 : index
      %12 = vector.load %arg7[%c0_10, %c0_11] : memref<32x64xf32, #tpu.memory_space<vmem>>, vector<32x64xf32>
      %c0_12 = arith.constant 0 : index
      %c0_13 = arith.constant 0 : index
      %13 = vector.load %arg5[%c0_12, %c0_13] : memref<1x64xf32, #tpu.memory_space<vmem>>, vector<1x64xf32>
      %14 = vector.broadcast %13 : vector<1x64xf32> to vector<32x64xf32>
      %15 = arith.addf %12, %14 : vector<32x64xf32>
      %16 = arith.truncf %15 : vector<32x64xf32> to vector<32x64xbf16>
      %c0_14 = arith.constant 0 : index
      %c0_15 = arith.constant 0 : index
      %17 = vector.load %arg6[%c0_14, %c0_15] : memref<32x64xbf16, #tpu.memory_space<vmem>>, vector<32x64xbf16>
      tpu.vector_store %arg6[%c0_14, %c0_15], %16 {strides = array<i32>} : memref<32x64xbf16, #tpu.memory_space<vmem>>, vector<32x64xbf16>,
    } else {
    }
    return
  }
  func.func @transform_0(%arg0: i32, %arg1: i32, %arg2: i32) -> (i32, i32) {
    %c0_i32 = arith.constant 0 : i32
    return %arg0, %arg2 : i32, i32
  }
  func.func @transform_1(%arg0: i32, %arg1: i32, %arg2: i32) -> (i32, i32) {
    %c0_i32 = arith.constant 0 : i32
    return %arg2, %arg1 : i32, i32
  }
  func.func @transform_2(%arg0: i32, %arg1: i32, %arg2: i32) -> (i32, i32) {
    %c0_i32 = arith.constant 0 : i32
    %c0_i32_0 = arith.constant 0 : i32
    return %c0_i32, %arg1 : i32, i32
  }
  func.func @transform_3(%arg0: i32, %arg1: i32, %arg2: i32) -> (i32, i32) {
    %c0_i32 = arith.constant 0 : i32
    return %arg0, %arg1 : i32, i32
  }
}

</mosaic_0001>

<bundles_post_ra>
// kernel: tpu_custom_call.1
= control target key start
LH: loop header
LB: loop body
LE: loop exit
PB: predicated region body
PF: predicated region fallthrough
CT: control target
= control target key end

     0   :  { %8 = vsyncpa [#allocation4], 0  ;;  %s400_s0 = inlined_call_operand.hbm [shape: bf16[32,32], index: 0, kind: input, shape index: {}]   ;;  %s401_s1 = inlined_call_operand.hbm [shape: bf16[32,64], index: 1, kind: input, shape index: {}]   ;;  %s402_s2 = inlined_call_operand.vmem [shape: f32[1,64], index: 2, kind: input, shape index: {}]   ;;  %s403_s3 = inlined_call_operand.hbm [shape: bf16[32,64], index: 3, kind: output, shape index: {}]  }
   0x1   :  { %9 = vsyncpa [#allocation7], 0 }
   0x2   :  { %10 = vsyncpa [#allocation5], 0  ;;  %s318_s12 = smov [#allocation3]   ;;  %s246_s16 = scalar_lea.hbm %s400_s0, 256 }
   0x3   :  { %s16_s13 = sshll.u32 %s318_s12, 4  ;;  %p247_p0 = scmp.ne.s32.totalorder %s400_s0, %s246_s16  ;;  %s17_s13 = int_to_ptr.vmem [resolvable:$true] %s16_s13 }
   0x4   :  { %p250_p1 = scmp.lt.u32.totalorder %s246_s16, %s400_s0 }
   0x6   :  { %p252_p2 = pnand %p250_p1, %p247_p0 }
   0x8   :  { %255 = shalt.err (!%p252_p2)
}
   0x9   :  { %s256_s21 = scalar_lea.vmem %s17_s13, 256  ;;  %p261_p4 = scmp.lt.s32.totalorder %s17_s13, %s17_s13 }
   0xa   :  { %p257_p3 = scmp.ne.s32.totalorder %s17_s13, %s256_s21  ;;  %p262_p5 = scmp.lt.s32.totalorder %s256_s21, %s256_s21 }
   0xc   :  { %p263_p6 = por %p262_p5, %p261_p4 }
   0xe   :  { %p264_p7 = pnand %p263_p6, %p257_p3 }
  0x10   :  { %267 = shalt.err (!%p264_p7)
}
  0x11   :  { %s319_s22 = smov 64   ;;  %s320_s23 = smov 4  }
  0x12   :  { %22 = dma.hbm_to_vmem [thread:$0]  %s400_s0, 256, %s17_s13, [#allocation4], %s319_s22, %s319_s22, %s320_s23  }
  0x13   :  { %s321_s26 = smov [#allocation6]   ;;  %s268_s30 = scalar_lea.hbm %s401_s1, 256 }
  0x14   :  { %s28_s27 = sshll.u32 %s321_s26, 4  ;;  %p269_p8 = scmp.ne.s32.totalorder %s401_s1, %s268_s30  ;;  %s29_s27 = int_to_ptr.vmem [resolvable:$true] %s28_s27 }
  0x15   :  { %p272_p9 = scmp.lt.u32.totalorder %s268_s30, %s401_s1 }
  0x17   :  { %p274_p10 = pnand %p272_p9, %p269_p8 }
  0x19   :  { %277 = shalt.err (!%p274_p10)
}
  0x1a   :  { %s278_s8 = scalar_lea.vmem %s29_s27, 256  ;;  %p283_p12 = scmp.lt.s32.totalorder %s29_s27, %s29_s27 }
  0x1b   :  { %p279_p11 = scmp.ne.s32.totalorder %s29_s27, %s278_s8  ;;  %p284_p13 = scmp.lt.s32.totalorder %s278_s8, %s278_s8 }
  0x1d   :  { %p285_p0 = por %p284_p13, %p283_p12 }
  0x1f   :  { %p286_p1 = pnand %p285_p0, %p279_p11 }
  0x21   :  { %289 = shalt.err (!%p286_p1)
}
  0x22   :  { %34 = dma.hbm_to_vmem [thread:$0]  %s401_s1, 256, %s29_s27, [#allocation7], %s319_s22, %s319_s22, %s320_s23  }
  0x23   :  { %312 = dma.done.wait [#allocation4], 256  }
  0x24   :  { %313 = vsyncadd [#allocation4], 4294967040 }
  0x25   :  { %314 = dma.done.wait [#allocation7], 256  }
  0x26   :  { %315 = vsyncadd [#allocation7], 4294967040  ;;  %vm48_vm0 = vcmask 523264   ;;  %v322_v0 = vmov 0.0   ;;  %v242_v1 = vld [vmem:[#allocation6] sm:$0xff]   ;;  %v243_v2 = vld [vmem:[#allocation6 + $0x8] sm:$0xff]  }
  0x27   :  { %51 = vst.msk [vmem:[#allocation2 + $0x10] sm:$0xff] %vm48_vm0, %v322_v0  ;;  %49 = vst.msk [vmem:[#allocation2] sm:$0xff] %vm48_vm0, %v322_v0  ;;  %vm87_vm1 = vcmask 261120   ;;  %228 = vmatprep.subr.bf16.mxu0 %v242_v1  ;;  %v244_v3 = vld [vmem:[#allocation3] sm:$0xff]   ;;  %v245_v4 = vld [vmem:[#allocation3 + $0x8] sm:$0xff]   ;;  %vm186_vm2 = vcmask 519168  }
  0x28   :  { %50 = vst.msk [vmem:[#allocation2 + $0x8] sm:$0xff] %vm48_vm0, %v322_v0  ;;  %52 = vst.msk [vmem:[#allocation2 + $0x18] sm:$0xff] %vm48_vm0, %v322_v0  ;;  %229 = vmatpush3.bf16.msra.mxu0 %v242_v1  ;;  %232 = vmatprep.mubr.msk.bf16.mxu0 %vm87_vm1, %v244_v3  ;;  %v215_v17 = vld [vmem:[%s402_s2] ss:$0 sm:$0xff]  ;;  %s323_s11 = smov [#allocation8]  }
  0x29   :  { %230 = vmatprep.subr.bf16.mxu0 %v243_v2  ;;  %s196_s12 = sshll.u32 %s323_s11, 4  ;;  %s197_s12 = int_to_ptr.vmem [resolvable:$true] %s196_s12 }
  0x2a   :  { %s290_s2 = scalar_lea.vmem %s197_s12, 256  ;;  %p295_p3 = scmp.lt.s32.totalorder %s197_s12, %s197_s12 }
  0x2b   :  { %p291_p2 = scmp.ne.s32.totalorder %s197_s12, %s290_s2  ;;  %p296_p4 = scmp.lt.s32.totalorder %s290_s2, %s290_s2 }
  0x2c   :  { %231 = vmatpush3.bf16.msra.mxu0 %v243_v2 }
  0x2d   :  { %p297_p5 = por %p296_p4, %p295_p3 }
  0x2e   :  { %v55_v5 = vld [vmem:[#allocation2 + $0x10] sm:$0xff]  ;;  %v53_v6 = vld [vmem:[#allocation2] sm:$0xff] }
  0x2f   :  { %233 = vmatmul.mubr.msk.bf16.vlgmr.msra.gmra.mrb[0].mxu0 %vm87_vm1, %v245_v4  ;;  %v56_v8 = vld [vmem:[#allocation2 + $0x18] sm:$0xff]  ;;  %v54_v11 = vld [vmem:[#allocation2 + $0x8] sm:$0xff]  ;;  %p298_p6 = pnand %p297_p5, %p291_p2 }
 0x102   :  { %v234_v7 = vpop.f32.mrb[0].mxu0 }
 0x103   :  { %v145_v9 = vadd.f32 %v234_v7, %v55_v5  ;;  %v128_v10 = vpop.f32.mrb[1].mxu0 }
 0x104   :  { %v143_v12 = vadd.f32 %v128_v10, %v53_v6  ;;  %v235_v13 = vpop.f32.mrb[2].mxu0 }
 0x105   :  { %150 = vst.msk [vmem:[#allocation2 + $0x10] sm:$0xff] %vm48_vm0, %v145_v9  ;;  %v146_v14 = vadd.f32 %v235_v13, %v56_v8  ;;  %v131_v15 = vpop.f32.mrb[3].mxu0 }
 0x106   :  { %148 = vst.msk [vmem:[#allocation2] sm:$0xff] %vm48_vm0, %v143_v12  ;;  %v144_v16 = vadd.f32 %v131_v15, %v54_v11 }
 0x107   :  { %151 = vst.msk [vmem:[#allocation2 + $0x18] sm:$0xff] %vm48_vm0, %v146_v14 }
 0x108   :  { %149 = vst.msk [vmem:[#allocation2 + $0x8] sm:$0xff] %vm48_vm0, %v144_v16 }
 0x10c   :  { %v157_v18 = vld [vmem:[#allocation2 + $0x10] sm:$0xff] }
 0x10d   :  { %v155_v19 = vld [vmem:[#allocation2] sm:$0xff]  ;;  %v168_v20 = vadd.f32 %v215_v17, %v157_v18 }
 0x10e   :  { %v158_v21 = vld [vmem:[#allocation2 + $0x18] sm:$0xff]  ;;  %v166_v22 = vadd.f32 %v215_v17, %v155_v19 }
 0x10f   :  { %v156_v23 = vld [vmem:[#allocation2 + $0x8] sm:$0xff]  ;;  %v169_v24 = vadd.f32 %v215_v17, %v158_v21  ;;  %v222_v25 = vpack.c.bf16 %v168_v20, %v168_v20 }
 0x110   :  { %v167_v26 = vadd.f32 %v215_v17, %v156_v23  ;;  %v220_v27 = vpack.c.bf16 %v166_v22, %v166_v22 }
 0x111   :  { %v223_v28 = vpack.c.bf16 %v169_v24, %v169_v24  ;;  %189 = vst.msk [vmem:[#allocation8 + $0x8] sm:$0xf] %vm186_vm2, %v222_v25 }
 0x112   :  { %v221_v29 = vpack.c.bf16 %v167_v26, %v167_v26  ;;  %187 = vst.msk [vmem:[#allocation8] sm:$0xf] %vm186_vm2, %v220_v27 }
 0x113   :  { %190 = vst.msk [vmem:[#allocation8 + $0xc] sm:$0xf] %vm186_vm2, %v223_v28 }
 0x114   :  { %188 = vst.msk [vmem:[#allocation8 + $0x4] sm:$0xf] %vm186_vm2, %v221_v29 }
 0x115   :  { %301 = shalt.err (!%p298_p6)
}
 0x116   :  { %s302_s15 = scalar_lea.hbm %s403_s3, 256 }
 0x117   :  { %p303_p7 = scmp.ne.s32.totalorder %s403_s3, %s302_s15  ;;  %p306_p8 = scmp.lt.u32.totalorder %s302_s15, %s403_s3 }
 0x119   :  { %p308_p9 = pnand %p306_p8, %p303_p7 }
 0x11b   :  { %311 = shalt.err (!%p308_p9)
}
 0x11c   :  { %202 = dma.vmem_to_hbm [thread:$0]  %s197_s12, 256, %s403_s3, [#allocation5], %s319_s22, %s319_s22, %s320_s23  }
 0x11d   :  { %316 = dma.done.wait [#allocation5], 256  }
 0x11e   :  { %317 = vsyncadd [#allocation5], 4294967040 }
 0x11f   :  { %206 = vsyncpa [#allocation4], 1 }
 0x120   :  { %207 = vsyncpa [#allocation7], 1 }
 0x121   :  { %208 = vsyncpa [#allocation5], 1 }

</bundles_post_ra>
